<compile_context>
chip_gen: v7x
topology: tpu7x:2x2x1
jax: 0.10.0
libtpu: 0.0.40
codegen_flags: <defaults>
</compile_context>

<pallas_src>
import functools

import jax
import jax.numpy as jnp
import numpy as np
from jax.experimental import pallas as pl
from jax.experimental.pallas import tpu as pltpu

_LANE = 128


def _round_up(v, m):
    return ((v + m - 1) // m) * m


def _sublane(dtype):
    # Sub-32-bit dtypes pack along sublanes: 8 rows (4B), 16 (2B), 32 (1B).
    return {4: 8, 2: 16, 1: 32}[np.dtype(dtype).itemsize]


@functools.lru_cache(maxsize=1)
def _vmem_limit_bytes():
    """Scoped-VMEM limit safe on v5e/v6e (128 MiB physical) and v7x (64 MiB)."""
    cap = None
    try:
        cap = getattr(pltpu.get_tpu_info(), "vmem_capacity_bytes", None)
    except Exception:
        cap = None
    if not cap:
        cap = 64 * 1024 * 1024  # conservative fallback = v7x physical size
    return min((int(cap) * 3) // 4, 96 * 1024 * 1024)


def _pick_divisor_tile(total, pref, mult):
    """Largest divisor of `total` that is a multiple of `mult` and <= pref."""
    if total <= pref:
        return total
    best = mult
    d = mult
    while d <= pref:
        if total % d == 0:
            best = d
        d += mult
    return best


# ----------------------------------------------------------------------------
# Kernels
# ----------------------------------------------------------------------------
def _mlp_wres_kernel(x_ref, w_ref, b_ref, o_ref):
    # Weight-resident path: whole weight/bias live in VMEM; grid is M only.
    y = jnp.dot(x_ref[...], w_ref[...], preferred_element_type=jnp.float32)
    y = y + b_ref[...].astype(jnp.float32)
    # LeakyReLU(0.1): max(y, 0.1*y)  (vmul + vmax, no compare/select)
    o_ref[...] = jnp.maximum(y, 0.1 * y).astype(o_ref.dtype)


def _mlp_tiled_kernel_f32(x_ref, w_ref, b_ref, o_ref):
    # f32 output: accumulate directly into the K-resident output block.
    k = pl.program_id(2)

    @pl.when(k == 0)
    def _():
        o_ref[...] = jnp.zeros_like(o_ref)

    o_ref[...] += jnp.dot(x_ref[...], w_ref[...], preferred_element_type=jnp.float32)

    @pl.when(k == pl.num_programs(2) - 1)
    def _():
        y = o_ref[...] + b_ref[...].astype(jnp.float32)
        o_ref[...] = jnp.maximum(y, 0.1 * y)


def _mlp_tiled_kernel_acc(x_ref, w_ref, b_ref, o_ref, acc_ref):
    # Narrow output dtype: keep an f32 scratch accumulator, cast on finalize.
    k = pl.program_id(2)

    @pl.when(k == 0)
    def _():
        acc_ref[...] = jnp.zeros_like(acc_ref)

    acc_ref[...] += jnp.dot(x_ref[...], w_ref[...], preferred_element_type=jnp.float32)

    @pl.when(k == pl.num_programs(2) - 1)
    def _():
        y = acc_ref[...] + b_ref[...].astype(jnp.float32)
        o_ref[...] = jnp.maximum(y, 0.1 * y).astype(o_ref.dtype)


# ----------------------------------------------------------------------------
# Parameter prep (one-time, at init) + forward
# ----------------------------------------------------------------------------
def prepare_params(weight, bias, compute_dtype=None):
    """One-time prep: PyTorch weight [n_out, n_in] -> padded [k_pad, n_pad]
    (x @ W layout) and bias [n_out] -> [1, n_pad].  Do NOT call per forward."""
    n_out, n_in = weight.shape
    if compute_dtype is not None:
        weight = weight.astype(compute_dtype)  # e.g. bf16 feed on v6e/v7x
    k_pad = _round_up(n_in, _LANE)
    n_pad = _round_up(n_out, _LANE)
    w_t = jnp.pad(weight.T, ((0, k_pad - n_in), (0, n_pad - n_out)))
    b2d = jnp.pad(bias.reshape(1, n_out), ((0, 0), (0, n_pad - n_out)))
    return w_t, b2d


@functools.partial(jax.jit, static_argnames=("n_out",))
def mlp_forward_prepared(x, w_t, b2d, *, n_out):
    """x: [..., n_in]; w_t: [k_pad, n_pad] from prepare_params; b2d: [1, n_pad]."""
    # TODO(synk): dropout is identity here (p=0 / eval mode); stochastic dropout
    # would use pltpu.prng_seed + pltpu.stateful_bernoulli inside the kernel.
    lead = x.shape[:-1]
    n_in = x.shape[-1]
    k_pad, n_pad = w_t.shape
    m = 1
    for d in lead:
        m *= d

    x_isz = x.dtype.itemsize
    w_isz = w_t.dtype.itemsize
    out_dtype = x.dtype
    o_isz = np.dtype(out_dtype).itemsize
    f32_out = np.dtype(out_dtype) == np.dtype(np.float32)
    sub = _sublane(x.dtype)

    vmem_limit = _vmem_limit_bytes()
    work = int(vmem_limit * 0.8)  # headroom for compiler-internal scratch

    x2d = x.reshape(m, n_in)
    if k_pad != n_in:
        x2d = jnp.pad(x2d, ((0, 0), (0, k_pad - n_in)))

    # ---- weight-resident fast path ------------------------------------------
    # (double-buffered allocation, but the constant index_map means it is
    #  DMA'd from HBM exactly once per call)
    w_vmem = 2 * k_pad * n_pad * w_isz + 2 * n_pad * b2d.dtype.itemsize
    use_wres = w_vmem <= work // 2
    if use_wres:
        per_row = 2 * k_pad * x_isz + 2 * n_pad * o_isz + n_pad * 4
        tm_cap = (work - w_vmem) // per_row
        tm = min(1024, int(tm_cap), _round_up(max(m, 1), sub))
        tm = (tm // sub) * sub
        if tm < sub:
            use_wres = False

    if use_wres:
        # v7x megacore: keep >=2 blocks on the parallel M axis when possible.
        if m > sub and tm >= _round_up(m, sub):
            tm = _round_up((m + 1) // 2, sub)
        m_pad = _round_up(max(m, 1), tm)
        if m_pad != m:
            x2d = jnp.pad(x2d, ((0, m_pad - m), (0, 0)))

        out = pl.pallas_call(
            _mlp_wres_kernel,
            out_shape=jax.ShapeDtypeStruct((m_pad, n_pad), out_dtype),
            grid_spec=pltpu.PrefetchScalarGridSpec(
                num_scalar_prefetch=0,
                grid=(m_pad // tm,),
                in_specs=[
                    pl.BlockSpec((tm, k_pad), lambda i: (i, 0)),
                    pl.BlockSpec((k_pad, n_pad), lambda i: (0, 0)),  # resident
                    pl.BlockSpec((1, n_pad), lambda i: (0, 0)),      # resident
                ],
                out_specs=pl.BlockSpec((tm, n_pad), lambda i: (i, 0)),
            ),
            compiler_params=pltpu.CompilerParams(
                dimension_semantics=("parallel",),
                vmem_limit_bytes=vmem_limit,
            ),
        )(x2d, w_t, b2d)
    else:
        # ---- general tiled (M, N, K) fallback --------------------------------
        tn = _pick_divisor_tile(n_pad, 512, _LANE)
        tk = _pick_divisor_tile(k_pad, 1024, _LANE)
        tm = min(512, _round_up(max(m, 1), sub))

        def fits(tm_, tn_, tk_):
            b = (2 * tm_ * tk_ * x_isz + 2 * tk_ * tn_ * w_isz
                 + 2 * tm_ * tn_ * o_isz + (0 if f32_out else tm_ * tn_ * 4))
            return b <= work

        while not fits(tm, tn, tk) and tk > _LANE:
            tk = _pick_divisor_tile(k_pad, tk // 2, _LANE)
        while not fits(tm, tn, tk) and tn > _LANE:
            tn = _pick_divisor_tile(n_pad, tn // 2, _LANE)
        while not fits(tm, tn, tk) and tm > sub:
            tm = max(sub, (tm // 2 // sub) * sub)
        if m > sub and tm >= _round_up(m, sub):
            tm = _round_up((m + 1) // 2, sub)

        m_pad = _round_up(max(m, 1), tm)
        if m_pad != m:
            x2d = jnp.pad(x2d, ((0, m_pad - m), (0, 0)))

        grid = (m_pad // tm, n_pad // tn, k_pad // tk)
        kernel = _mlp_tiled_kernel_f32 if f32_out else _mlp_tiled_kernel_acc
        scratch = [] if f32_out else [pltpu.VMEM((tm, tn), jnp.float32)]

        out = pl.pallas_call(
            kernel,
            out_shape=jax.ShapeDtypeStruct((m_pad, n_pad), out_dtype),
            grid_spec=pltpu.PrefetchScalarGridSpec(
                num_scalar_prefetch=0,
                grid=grid,
                in_specs=[
                    pl.BlockSpec((tm, tk), lambda i, j, k: (i, k)),
                    pl.BlockSpec((tk, tn), lambda i, j, k: (k, j)),
                    pl.BlockSpec((1, tn), lambda i, j, k: (0, j)),  # K-invariant
                ],
                out_specs=pl.BlockSpec((tm, tn), lambda i, j, k: (i, j)),
                scratch_shapes=scratch,
            ),
            compiler_params=pltpu.CompilerParams(
                dimension_semantics=("parallel", "parallel", "arbitrary"),
                vmem_limit_bytes=vmem_limit,
            ),
        )(x2d, w_t, b2d)

    out = out[:m, :n_out]
    return out.reshape(*lead, n_out)


def mlp_forward(x, weight, bias, compute_dtype=None):
    """Convenience wrapper taking PyTorch-layout params ([n_out, n_in], [n_out]).
    Prefer prepare_params() once at init + mlp_forward_prepared() per step."""
    w_t, b2d = prepare_params(weight, bias, compute_dtype)
    return mlp_forward_prepared(x, w_t, b2d, n_out=weight.shape[0])


def _ref_forward(x, weight, bias):
    y = jnp.einsum("...i,oi->...o", x, weight) + bias
    return jnp.where(y >= 0, y, 0.1 * y)


if __name__ == "__main__":
    key = jax.random.PRNGKey(0)
    n_in, n_out = 32, 64
    batch, seq = 2, 8

    kx, kw, kb = jax.random.split(key, 3)
    x = jax.random.normal(kx, (batch, seq, n_in), dtype=jnp.float32)
    # Mimic nn.Linear's uniform(-1/sqrt(n_in), 1/sqrt(n_in)) init.
    bound = 1.0 / (n_in ** 0.5)
    weight = jax.random.uniform(kw, (n_out, n_in), minval=-bound, maxval=bound,
                                dtype=jnp.float32)
    bias = jax.random.uniform(kb, (n_out,), minval=-bound, maxval=bound,
                              dtype=jnp.float32)

    # One-time parameter prep (transpose + pad hoisted out of the forward).
    w_t, b2d = prepare_params(weight, bias)

    out = mlp_forward_prepared(x, w_t, b2d, n_out=n_out)
    out = jax.block_until_ready(out)

    ref = _ref_forward(x, weight, bias)
    assert out.shape == (batch, seq, n_out)
    assert jnp.allclose(out, ref, atol=1e-5, rtol=1e-5)

    print("KERNEL_OK")
</pallas_src>

<mosaic_0001>
module attributes {stable_mosaic.version = 11 : i64} {
  func.func @_mlp_wres_kernel(%arg0: i32, %arg1: memref<8x128xf32, #tpu.memory_space<vmem>>, %arg2: memref<128x128xf32, #tpu.memory_space<vmem>>, %arg3: memref<1x128xf32, #tpu.memory_space<vmem>>, %arg4: memref<8x128xf32, #tpu.memory_space<vmem>>) attributes {dimension_semantics = [#tpu.dimension_semantics<parallel>], iteration_bounds = array<i64: 2>, scalar_prefetch = 0 : i64, scratch_operands = 0 : i64, tpu.core_type = #tpu.core_type<tc>, window_params = [{transform_indices = @transform_0, window_bounds = array<i64: 8, 128>}, {pipeline_mode = #tpu.pipeline_mode<synchronous>, transform_indices = @transform_1, window_bounds = array<i64: 128, 128>}, {pipeline_mode = #tpu.pipeline_mode<synchronous>, transform_indices = @transform_2, window_bounds = array<i64: 1, 128>}, {transform_indices = @transform_3, window_bounds = array<i64: 8, 128>}]} {
    %c0 = arith.constant 0 : index
    %c0_0 = arith.constant 0 : index
    %0 = vector.load %arg1[%c0, %c0_0] : memref<8x128xf32, #tpu.memory_space<vmem>>, vector<8x128xf32>
    %c0_1 = arith.constant 0 : index
    %c0_2 = arith.constant 0 : index
    %1 = vector.load %arg2[%c0_1, %c0_2] : memref<128x128xf32, #tpu.memory_space<vmem>>, vector<128x128xf32>
    %cst = arith.constant dense<0.000000e+00> : vector<8x128xf32>
    %2 = tpu.matmul %0, %1, %cst {dimension_numbers = #tpu.dot_dimension_numbers<[1], [0], [0], [1], [0, 0, 1, 1], [], []>} : vector<8x128xf32>, vector<128x128xf32>, vector<8x128xf32> -> vector<8x128xf32>
    %c0_3 = arith.constant 0 : index
    %c0_4 = arith.constant 0 : index
    %3 = vector.load %arg3[%c0_3, %c0_4] : memref<1x128xf32, #tpu.memory_space<vmem>>, vector<1x128xf32>
    %4 = vector.broadcast %3 : vector<1x128xf32> to vector<8x128xf32>
    %5 = arith.addf %2, %4 : vector<8x128xf32>
    %cst_5 = arith.constant 1.000000e-01 : f32
    %6 = vector.broadcast %cst_5 : f32 to vector<8x128xf32>
    %7 = arith.mulf %6, %5 : vector<8x128xf32>
    %8 = arith.maximumf %5, %7 : vector<8x128xf32>
    %c0_6 = arith.constant 0 : index
    %c0_7 = arith.constant 0 : index
    %9 = vector.load %arg4[%c0_6, %c0_7] : memref<8x128xf32, #tpu.memory_space<vmem>>, vector<8x128xf32>
    tpu.vector_store %arg4[%c0_6, %c0_7], %8 {strides = array<i32>} : memref<8x128xf32, #tpu.memory_space<vmem>>, vector<8x128xf32>,
    return
  }
  func.func @transform_0(%arg0: i32) -> (i32, i32) {
    %c0_i32 = arith.constant 0 : i32
    %c0_i32_0 = arith.constant 0 : i32
    return %arg0, %c0_i32 : i32, i32
  }
  func.func @transform_1(%arg0: i32) -> (i32, i32) {
    %c0_i32 = arith.constant 0 : i32
    %c0_i32_0 = arith.constant 0 : i32
    %c0_i32_1 = arith.constant 0 : i32
    return %c0_i32, %c0_i32_0 : i32, i32
  }
  func.func @transform_2(%arg0: i32) -> (i32, i32) {
    %c0_i32 = arith.constant 0 : i32
    %c0_i32_0 = arith.constant 0 : i32
    %c0_i32_1 = arith.constant 0 : i32
    return %c0_i32, %c0_i32_0 : i32, i32
  }
  func.func @transform_3(%arg0: i32) -> (i32, i32) {
    %c0_i32 = arith.constant 0 : i32
    %c0_i32_0 = arith.constant 0 : i32
    return %arg0, %c0_i32 : i32, i32
  }
}

</mosaic_0001>

<bundles_post_ra>
// kernel: mlp_forward_prepared.1
= control target key start
LH: loop header
LB: loop body
LE: loop exit
PB: predicated region body
PF: predicated region fallthrough
CT: control target
= control target key end

     0   :  { %8 = vsyncpa [#allocation3], 0  ;;  %s521_s12 = smov 0   ;;  %s580_s0 = inlined_call_operand.vmem [shape: f32[16,128], index: 0, kind: input, shape index: {}]   ;;  %s581_s1 = inlined_call_operand.hbm [shape: f32[128,128], index: 1, kind: input, shape index: {}]   ;;  %s582_s2 = inlined_call_operand.vmem [shape: f32[1,128], index: 2, kind: input, shape index: {}]   ;;  %s583_s3 = inlined_call_operand.vmem [shape: f32[16,128], index: 3, kind: output, shape index: {}]  }
   0x1 LB: > { %s527_s13 = sadd.s32 4294967295, %s493_s12   ;;  %p345_p0 = scmp.ge.s32.totalorder %s493_s12, 1  ;;  %s493_s12 = sphi %s521_s12, %s14_s12  }
   0x2   : > { %p113_p1 = scmp.lt.s32.totalorder %s493_s12, 3  ;;  %s495_s14 = smov [#allocation2]  }
   0x3   : > { %s125_s15 = sshll.u32 %s495_s14, 4  ;;  %p584_p3 = scmp.eq.s32.totalorder %s527_s13, 0  ;;  %s126_s15 = int_to_ptr.vmem [resolvable:$true] %s125_s15 }
   0x4   : > { %p531_p2 = pnand %p345_p0, %p113_p1  ;;  %s455_s20 = scalar_lea.hbm %s581_s1, 2048 }
   0x5   : > { %p456_p6 = scmp.ne.s32.totalorder %s581_s1, %s455_s20  ;;  %p462_p10 = scmp.lt.u32.totalorder %s455_s20, %s581_s1 }
   0x6   : > { %s586_s16 = scalar_select %p531_p2, 1, 0 }
   0x7   : > { %p435_p4 = pneg %p531_p2 }
   0x9   : > { %p540_p5 = pnand %p584_p3, %p435_p4 }
   0xb   : > { %p457_p7 = pneg %p540_p5 }
   0xd   : > { %p458_p8 = pnand %p457_p7, %p456_p6 }
   0xf   : > { %p459_p9 = pneg %p458_p8 }
  0x11   : > { %p464_p11 = pnand %p462_p10, %p459_p9 }
  0x13   : > { %467 = shalt.err (!%p464_p11)
}
  0x14   : > { %s468_s25 = scalar_lea.vmem %s126_s15, 2048  ;;  %p476_p1 = scmp.lt.s32.totalorder %s126_s15, %s126_s15 }
  0x15   : > { %p469_p12 = scmp.ne.s32.totalorder %s126_s15, %s468_s25  ;;  %p477_p4 = scmp.lt.s32.totalorder %s468_s25, %s468_s25 }
  0x17   : > { %p471_p13 = pnand %p469_p12, %p457_p7  ;;  %p478_p3 = por %p477_p4, %p476_p1 }
  0x19   : > { %p472_p0 = pneg %p471_p13 }
  0x1b   : > { %p479_p2 = pnand %p478_p3, %p472_p0 }
  0x1d   : > { %482 = shalt.err (!%p479_p2)
}
  0x1e   : > { %s496_s26 = smov 128   ;;  %s497_s27 = smov 8  }
  0x1f   : > { %438 = dma.hbm_to_vmem [thread:$0]  (!%p540_p5), %s581_s1, 2048, %s126_s15, [#allocation3], %s496_s26, %s496_s26, %s497_s27  }
  0x20   : > { %p588_p6 = scmp.ne.s32.totalorder %s586_s16, 0 }
  0x21   : > { %p589_p8 = scmp.eq.s32.totalorder (!%p588_p6), %s527_s13, 0 }
  0x22   : > { %151 = sbr.rel (%p588_p6) target bundleno = 295 (0x127), region = 32 }
  0x29   : > { %488 = dma.done.wait (%p589_p8), [#allocation3], 2048   ;;  %p590_p7 = pmov %p589_p8 }
  0x2a   : > { %v498_v0 = vmov 0.0|0.0   ;;  %vm499_vm0 = vmmov 0   ;;  %v500_v1 = vmov 0.0   ;;  %v182_v2 = vld [vmem:[#allocation2] sm:$0xff]  ;;  %v183_v3 = vld [vmem:[#allocation2 + $0x8] sm:$0xff]  ;;  %v184_v4 = vld [vmem:[#allocation2 + $0x10] sm:$0xff] }
  0x2b   : > { %490 = vsyncadd (%p590_p7), [#allocation3], 4294965248  ;;  %407 = vmatprep.subr.bf16.mxu0 %v498_v0  ;;  %404 = vmatprep.mubr.msk.f32.mxu0 %vm499_vm0, %v500_v1  ;;  %v408_v5 = vpack.c.bf16 %v183_v3, %v182_v2  ;;  %v185_v6 = vld [vmem:[#allocation2 + $0x18] sm:$0xff]  ;;  %v186_v8 = vld [vmem:[#allocation2 + $0x20] sm:$0xff]  ;;  %p173_p2 = scmp.lt.s32.totalorder %s527_s13, 1 }
  0x2c   : > { %v411_v7 = vpack.c.bf16 %v185_v6, %v184_v4  ;;  %v187_v9 = vld [vmem:[#allocation2 + $0x28] sm:$0xff]  ;;  %v188_v11 = vld [vmem:[#allocation2 + $0x30] sm:$0xff]  ;;  %v189_v12 = vld [vmem:[#allocation2 + $0x38] sm:$0xff] }
  0x2d   : > { %409 = vmatpush3.bf16.msra.mxu0 %v408_v5  ;;  %v414_v10 = vpack.c.bf16 %v187_v9, %v186_v8  ;;  %v417_v13 = vpack.c.bf16 %v189_v12, %v188_v11  ;;  %v190_v14 = vld [vmem:[#allocation2 + $0x40] sm:$0xff]  ;;  %v191_v15 = vld [vmem:[#allocation2 + $0x48] sm:$0xff]  ;;  %v192_v17 = vld [vmem:[#allocation2 + $0x50] sm:$0xff]  ;;  %s592_s13 = smov (!%p173_p2, %s527_s13), 1 }
  0x2e   : > { %410 = vmatprep.subr.bf16.mxu0 %v498_v0  ;;  %v420_v16 = vpack.c.bf16 %v191_v15, %v190_v14  ;;  %v193_v18 = vld [vmem:[#allocation2 + $0x58] sm:$0xff]  ;;  %v194_v20 = vld [vmem:[#allocation2 + $0x60] sm:$0xff]  ;;  %v195_v21 = vld [vmem:[#allocation2 + $0x68] sm:$0xff]  ;;  %s350_s30 = sshll.u32 %s592_s13, 3 }
  0x2f   : > { %v423_v19 = vpack.c.bf16 %v193_v18, %v192_v17  ;;  %v426_v22 = vpack.c.bf16 %v195_v21, %v194_v20  ;;  %v196_v23 = vld [vmem:[#allocation2 + $0x70] sm:$0xff]  ;;  %v197_v24 = vld [vmem:[#allocation2 + $0x78] sm:$0xff]  ;;  %s176_s6 = scalar_lea.vmem %s580_s0, %s350_s30  ;;  %v352_v27 = vld [vmem:[%s582_s2] ss:$0 sm:$0xff]  ;;  %s180_s11 = scalar_lea.vmem %s583_s3, %s350_s30 }
  0x30   : > { %v429_v25 = vpack.c.bf16 %v197_v24, %v196_v23  ;;  %v181_v26 = vld [vmem:[%s176_s6] sm:$0xff] }
  0x31   : > { %412 = vmatpush3.bf16.msra.mxu0 %v411_v7 }
  0x32   : > { %413 = vmatprep.subr.bf16.mxu0 %v498_v0 }
  0x35   : > { %415 = vmatpush3.bf16.msra.mxu0 %v414_v10 }
  0x36   : > { %416 = vmatprep.subr.bf16.mxu0 %v498_v0 }
  0x39   : > { %418 = vmatpush3.bf16.msra.mxu0 %v417_v13 }
  0x3a   : > { %419 = vmatprep.subr.bf16.mxu0 %v498_v0 }
  0x3d   : > { %421 = vmatpush3.bf16.msra.mxu0 %v420_v16 }
  0x3e   : > { %422 = vmatprep.subr.bf16.mxu0 %v498_v0 }
  0x41   : > { %424 = vmatpush3.bf16.msra.mxu0 %v423_v19 }
  0x42   : > { %425 = vmatprep.subr.bf16.mxu0 %v498_v0 }
  0x45   : > { %427 = vmatpush3.bf16.msra.mxu0 %v426_v22 }
  0x46   : > { %428 = vmatprep.subr.bf16.mxu0 %v498_v0 }
  0x49   : > { %430 = vmatpush3.bf16.msra.mxu0 %v429_v25 }
  0x4c   : > { %405 = vmatmul.mubr.f32.vlgmr.msra.gmra.mrb[0].mxu0 %v181_v26 }
 0x11f   : > { %v271_v28 = vpop.f32.mrb[0].mxu0 }
 0x120   : > { %v272_v29 = vadd.f32 %v352_v27, %v271_v28  ;;  %v406_v30 = vpop.f32.mrb[1].mxu0 }
 0x122   : > { %v275_v31 = vmul.f32 0.1, %v272_v29 }
 0x124   : > { %v276_v32 = vmax.f32 %v272_v29, %v275_v31 }
 0x126   : > { %277 = vst [vmem:[%s180_s11] sm:$0xff] %v276_v32 }
 0x127 PF: > { %s14_s12 = sadd.s32 1, %s493_s12  }
 0x128   : > { %p11_p3 = scmp.ge.s32.totalorder %s14_s12, 4  }
 0x12a   :  { %13 = sbr.rel (!%p11_p3) target bundleno = 1 (0x1), region = 67 }
 0x131   :  { %297 = vsyncpa [#allocation3], 1 }
 0x132   :  { %299 = vsyncpa [#allocation3 + $0x1], 1 }

</bundles_post_ra>
